<compile_context>
chip_gen: v5e
topology: v5e:2x2
jax: 0.10.0
libtpu: 0.0.40
codegen_flags: <defaults>
</compile_context>

<pallas_src>
import jax
import jax.numpy as jnp
from jax import lax
from jax.experimental import pallas as pl
from jax.experimental.pallas import tpu as pltpu

LANE = 128


def _sum_bias_kernel(bias_ref, x_ref, out_ref, acc_ref):
    """One grid step of grid = (batch_blocks, feature_blocks).

    The feature axis (last, "arbitrary") is the reduction axis: the output block index
    is constant along it, so out_ref / acc_ref stay resident while x tiles stream
    through the double-buffered pipeline. acc_ref is a lane-wide (block_b, 128) f32
    accumulator: each step does only VPU adds; the one XLU cross-lane reduce happens
    at finalize.
    """
    k = pl.program_id(1)

    @pl.when(k == 0)
    def _init():
        acc_ref[...] = jnp.zeros_like(acc_ref)

    block_d = x_ref.shape[1]
    n_full = block_d // LANE
    rem = block_d % LANE

    if n_full > 0:
        if n_full <= 8:
            # Short fixed trip count: straight-line unrolled adds (LLO-visible).
            for j in range(n_full):
                start = pl.multiple_of(j * LANE, LANE)
                acc_ref[...] += x_ref[:, pl.ds(start, LANE)].astype(jnp.float32)
        else:
            def _chunk(j, carry):
                start = pl.multiple_of(j * LANE, LANE)
                # Cast per 128-lane chunk (keeps f32 temporaries to a few vregs).
                acc_ref[...] += x_ref[:, pl.ds(start, LANE)].astype(jnp.float32)
                return carry

            lax.fori_loop(0, n_full, _chunk, 0, unroll=False)

    if rem:
        # Tail lanes (only when block_d == D and D is not a multiple of 128).
        acc_ref[:, :rem] += x_ref[:, n_full * LANE:].astype(jnp.float32)

    @pl.when(k == pl.num_programs(1) - 1)
    def _finalize():
        # Single cross-lane reduce per row-block; output bytes are ~1/D of input
        # bytes, so the narrow (block_b, 1) store is negligible vs. the input DMA.
        row_sum = jnp.sum(acc_ref[...], axis=1, keepdims=True)
        out_ref[...] = (row_sum + bias_ref[0]).astype(out_ref.dtype)


def _round_up(n, m):
    return ((n + m - 1) // m) * m


def linear_layer_forward(x, bias, *, block_b=None, block_d=None,
                         target_tile_bytes=8 * 1024 * 1024,
                         vmem_limit_bytes=48 * 1024 * 1024):
    """Pallas equivalent of `torch.sum(x, dim=1) + bias` for 2-D x and bias of size 1."""
    assert x.ndim == 2, "kernel implements the 2-D [batch, features] case"
    assert bias.size == 1, "module default output_dim=1 (scalar bias broadcast)"
    B, D = x.shape
    dtype_bytes = jnp.dtype(x.dtype).itemsize
    # Sublane tile of the second-to-last dim: 8 (f32), 16 (bf16), 32 (int8/fp8).
    sublane = max(8, 32 // max(dtype_bytes, 1))

    # ---- Tile selection -----------------------------------------------------
    # Rows: sublane multiple, <= 512 (amortizes finalize + per-step overhead) and
    # <= ~B/2 so the batch ("parallel") axis has >= 2 blocks whenever possible.
    if block_b is None:
        if B <= sublane:
            block_b = B
        else:
            half_rows = max(sublane, _round_up(B, 2 * sublane) // 2)
            block_b = min(512, half_rows)
    if block_d is None:
        if block_b * D * dtype_bytes <= target_tile_bytes:
            block_d = D          # whole feature dim per tile: one reduction step
        else:
            bd_budget = max(LANE, (target_tile_bytes // (block_b * dtype_bytes))
                            // LANE * LANE)
            if bd_budget >= D:
                block_d = D
            else:
                # Spread D evenly over the reduction steps to minimize padding.
                n_steps = pl.cdiv(D, bd_budget)
                block_d = _round_up(pl.cdiv(D, n_steps), LANE)

    # ---- Zero-pad so blocks divide exactly (no undefined tail tiles) --------
    # Zero feature columns add 0 to the row sums; padded batch rows are sliced off.
    B_pad = B if block_b == B else _round_up(B, block_b)
    D_pad = D if block_d == D else _round_up(D, block_d)
    if (B_pad, D_pad) != (B, D):
        x = jnp.pad(x, ((0, B_pad - B), (0, D_pad - D)))

    grid = (B_pad // block_b, D_pad // block_d)
    bias_smem = bias.reshape(1).astype(jnp.float32)

    cost = pl.CostEstimate(
        flops=B_pad * D_pad + B_pad,
        transcendentals=0,
        bytes_accessed=B_pad * D_pad * dtype_bytes + B_pad * dtype_bytes + 4,
    )

    out = pl.pallas_call(
        _sum_bias_kernel,
        out_shape=jax.ShapeDtypeStruct((B_pad, 1), x.dtype),
        grid_spec=pltpu.PrefetchScalarGridSpec(
            num_scalar_prefetch=0,
            grid=grid,
            in_specs=[
                # Scalar bias lives in SMEM: no per-step VMEM DMA, no padded vreg tile.
                pl.BlockSpec(memory_space=pltpu.MemorySpace.SMEM),
                pl.BlockSpec((block_b, block_d), lambda i, k: (i, k)),
            ],
            out_specs=pl.BlockSpec((block_b, 1), lambda i, k: (i, 0)),
            scratch_shapes=[pltpu.VMEM((block_b, LANE), jnp.float32)],
        ),
        compiler_params=pltpu.CompilerParams(
            # Batch axis parallel (megacore sharding on v7x), feature reduction arbitrary.
            dimension_semantics=("parallel", "arbitrary"),
            vmem_limit_bytes=vmem_limit_bytes,
        ),
        cost_estimate=cost,
    )(bias_smem, x)
    return out[:B, 0]


if __name__ == "__main__":
    key = jax.random.PRNGKey(0)

    # 1) Small shapes consistent with the module: x [batch=8, features=32].
    B, D = 8, 32
    x = jax.random.normal(key, (B, D), dtype=jnp.float32)
    bias = jnp.zeros((1,), dtype=jnp.float32)  # nn.Parameter(torch.zeros((1,)))
    y = jax.block_until_ready(linear_layer_forward(x, bias))
    ref = jnp.sum(x, axis=1) + bias
    assert y.shape == (B,)
    assert jnp.allclose(y, ref, atol=1e-5, rtol=1e-5)

    # 2) Explicitly tiled / pipelined path: batch blocks + feature-reduction grid axis
    #    with the resident f32 accumulator and pl.when init/finalize.
    B2, D2 = 128, 512
    x2 = jax.random.normal(jax.random.PRNGKey(1), (B2, D2), dtype=jnp.float32)
    bias2 = jnp.full((1,), 0.5, dtype=jnp.float32)
    y2 = jax.block_until_ready(linear_layer_forward(x2, bias2, block_b=64, block_d=128))
    ref2 = jnp.sum(x2, axis=1) + bias2
    assert y2.shape == (B2,) and jnp.allclose(y2, ref2, atol=1e-4, rtol=1e-4)

    # 3) Auto-tiled large feature dim (small artificial tile budget forces the
    #    multi-step reduction axis and the fori_loop lane-chunk path).
    B3, D3 = 32, 4096
    x3 = jax.random.normal(jax.random.PRNGKey(2), (B3, D3), dtype=jnp.float32)
    bias3 = jnp.full((1,), -1.25, dtype=jnp.float32)
    y3 = jax.block_until_ready(
        linear_layer_forward(x3, bias3, target_tile_bytes=128 * 1024))
    ref3 = jnp.sum(x3, axis=1) + bias3
    assert y3.shape == (B3,) and jnp.allclose(y3, ref3, atol=1e-3, rtol=1e-4)

    # 4) Non-divisible batch/features: wrapper zero-pads, result sliced back.
    B4, D4 = 10, 200
    x4 = jax.random.normal(jax.random.PRNGKey(3), (B4, D4), dtype=jnp.float32)
    bias4 = jnp.full((1,), 2.0, dtype=jnp.float32)
    y4 = jax.block_until_ready(linear_layer_forward(x4, bias4))
    ref4 = jnp.sum(x4, axis=1) + bias4
    assert y4.shape == (B4,) and jnp.allclose(y4, ref4, atol=1e-4, rtol=1e-4)

    print("KERNEL_OK")
</pallas_src>

<mosaic_0001>
module attributes {stable_mosaic.version = 11 : i64} {
  func.func @_sum_bias_kernel(%arg0: i32, %arg1: i32, %arg2: memref<1xf32, #tpu.memory_space<smem>>, %arg3: memref<8x32xf32, #tpu.memory_space<vmem>>, %arg4: memref<8x1xf32, #tpu.memory_space<vmem>>, %arg5: memref<8x128xf32, #tpu.memory_space<vmem>>) attributes {dimension_semantics = [#tpu.dimension_semantics<parallel>, #tpu.dimension_semantics<arbitrary>], iteration_bounds = array<i64: 1, 1>, scalar_prefetch = 0 : i64, scratch_operands = 1 : i64, tpu.core_type = #tpu.core_type<tc>, window_params = [{transform_indices = @transform_0, window_bounds = array<i64: 1>}, {transform_indices = @transform_1, window_bounds = array<i64: 8, 32>}, {transform_indices = @transform_2, window_bounds = array<i64: 8, 1>}]} {
    %c0_i32 = arith.constant 0 : i32
    %0 = arith.cmpi eq, %arg1, %c0_i32 : i32
    %1 = arith.extui %0 : i1 to i32
    %c0_i32_0 = arith.constant 0 : i32
    %2 = arith.cmpi ne, %1, %c0_i32_0 : i32
    scf.if %2 {
      %cst = arith.constant 0.000000e+00 : f32
      %10 = vector.broadcast %cst : f32 to vector<8x128xf32>
      %c0_8 = arith.constant 0 : index
      %c0_9 = arith.constant 0 : index
      %11 = vector.load %arg5[%c0_8, %c0_9] : memref<8x128xf32, #tpu.memory_space<vmem>>, vector<8x128xf32>
      tpu.vector_store %arg5[%c0_8, %c0_9], %10 {strides = array<i32>} : memref<8x128xf32, #tpu.memory_space<vmem>>, vector<8x128xf32>,
    } else {
    }
    %c0 = arith.constant 0 : index
    %c0_1 = arith.constant 0 : index
    %3 = vector.load %arg5[%c0, %c0_1] : memref<8x128xf32, #tpu.memory_space<vmem>>, vector<8x32xf32>
    %c0_2 = arith.constant 0 : index
    %c0_3 = arith.constant 0 : index
    %4 = vector.load %arg3[%c0_2, %c0_3] : memref<8x32xf32, #tpu.memory_space<vmem>>, vector<8x32xf32>
    %5 = arith.addf %3, %4 : vector<8x32xf32>
    %c0_4 = arith.constant 0 : index
    %c0_5 = arith.constant 0 : index
    %6 = vector.load %arg5[%c0_4, %c0_5] : memref<8x128xf32, #tpu.memory_space<vmem>>, vector<8x32xf32>
    tpu.vector_store %arg5[%c0_4, %c0_5], %5 {strides = array<i32>} : memref<8x128xf32, #tpu.memory_space<vmem>>, vector<8x32xf32>,
    %c0_i32_6 = arith.constant 0 : i32
    %7 = arith.cmpi eq, %arg1, %c0_i32_6 : i32
    %8 = arith.extui %7 : i1 to i32
    %c0_i32_7 = arith.constant 0 : i32
    %9 = arith.cmpi ne, %8, %c0_i32_7 : i32
    scf.if %9 {
      %c0_8 = arith.constant 0 : index
      %c0_9 = arith.constant 0 : index
      %10 = vector.load %arg5[%c0_8, %c0_9] : memref<8x128xf32, #tpu.memory_space<vmem>>, vector<8x128xf32>
      %cst = arith.constant dense<0.000000e+00> : vector<8xf32>
      %11 = vector.multi_reduction <add>, %10, %cst [1] : vector<8x128xf32> to vector<8xf32>
      %12 = vector.shape_cast %11 : vector<8xf32> to vector<8x1xf32>
      %c0_10 = arith.constant 0 : index
      %13 = memref.load %arg2[%c0_10] : memref<1xf32, #tpu.memory_space<smem>>
      %14 = vector.broadcast %13 : f32 to vector<8x1xf32>
      %15 = arith.addf %12, %14 : vector<8x1xf32>
      %c0_11 = arith.constant 0 : index
      %c0_12 = arith.constant 0 : index
      %16 = vector.load %arg4[%c0_11, %c0_12] : memref<8x1xf32, #tpu.memory_space<vmem>>, vector<8x1xf32>
      tpu.vector_store %arg4[%c0_11, %c0_12], %15 {strides = array<i32>} : memref<8x1xf32, #tpu.memory_space<vmem>>, vector<8x1xf32>,
    } else {
    }
    return
  }
  func.func @transform_0(%arg0: i32, %arg1: i32) -> i32 {
    %c0_i32 = arith.constant 0 : i32
    %c0_i32_0 = arith.constant 0 : i32
    return %c0_i32 : i32
  }
  func.func @transform_1(%arg0: i32, %arg1: i32) -> (i32, i32) {
    %c0_i32 = arith.constant 0 : i32
    return %arg0, %arg1 : i32, i32
  }
  func.func @transform_2(%arg0: i32, %arg1: i32) -> (i32, i32) {
    %c0_i32 = arith.constant 0 : i32
    %c0_i32_0 = arith.constant 0 : i32
    return %arg0, %c0_i32 : i32, i32
  }
}

</mosaic_0001>

<bundles_post_ra>
// kernel: tpu_custom_call.1
= control target key start
LH: loop header
LB: loop body
LE: loop exit
PB: predicated region body
PF: predicated region fallthrough
CT: control target
= control target key end

     0   :  { %8 = vsyncpa [#allocation5], 0  ;;  %s80_s12 = smov [#allocation4]   ;;  %s106_s0 = inlined_call_operand.<no memory space> [shape: f32[1], index: 0, kind: input, shape index: {}]   ;;  %s107_s1 = inlined_call_operand.hbm [shape: f32[8,32], index: 1, kind: input, shape index: {}]   ;;  %s108_s2 = inlined_call_operand.vmem [shape: f32[8,1], index: 2, kind: output, shape index: {}]  }
   0x1   :  { %s16_s11 = sshll.u32 %s107_s1, 4  ;;  %s18_s13 = sshll.u32 %s80_s12, 4  ;;  %s17_s11 = int_to_ptr.hbm [resolvable:$true] %s16_s11  ;;  %s19_s13 = int_to_ptr.vmem [resolvable:$true] %s18_s13 }
   0x2   :  { %21 = dma.hbm_to_vmem [thread:$0]  %s17_s11, 128, %s19_s13, [#allocation5]  }
   0x3   :  { %78 = dma.done.wait [#allocation5], 128  }
   0x4   :  { %79 = vsyncadd [#allocation5], 4294967168  ;;  %v81_v0 = vmov 0.0   ;;  %v32_v1 = vld [vmem:[#allocation4] sm:$0xff]  ;;  %vm34_vm0 = vcmask 261120   ;;  %v43_v3 = vstv %s106_s0  ;;  %vm45_vm1 = vcmask 7168  }
   0x5   :  { %30 = vst [vmem:[#allocation2] sm:$0xff] %v81_v0 }
   0x6   :  { %35 = vst.msk [vmem:[#allocation2] sm:$0xff] %vm34_vm0, %v32_v1 }
   0xd   :  { %v39_v2 = vld [vmem:[#allocation2] sm:$0xff] }
   0xe   :  { %40 = vadd.xlane.f32.xlu0 %v39_v2 }
  0x81   :  { %v41_v4 = vpop.xlane.xlu0 %40 }
  0x82   :  { %v44_v5 = vadd.f32 %v43_v3, %v41_v4 }
  0x84   :  { %46 = vst.msk [vmem:[%s108_s2] sm:$0xff] %vm45_vm1, %v44_v5 }
  0x85   :  { %51 = vsyncpa [#allocation5], 1 }

</bundles_post_ra>
